<compile_context>
chip_gen: v7x
topology: tpu7x:2x2x1
jax: 0.10.0
libtpu: 0.0.40
codegen_flags: <defaults>
</compile_context>

<pallas_src>
import functools

import jax
import jax.numpy as jnp
from jax.experimental import pallas as pl
from jax.experimental.pallas import tpu as pltpu

EPS_NORM = 1e-12   # torch.nn.functional.normalize eps (CosineSimilarity)
EPS_DICE = 1e-7    # segmentation_models_pytorch DiceLoss eps (smooth = 0.0)


def _lane_psum(v, nch):
    """Pairwise-tree sum of (K, nch*128) -> (K, 128) per-lane partials."""
    parts = [v[:, c * 128:(c + 1) * 128] for c in range(nch)]
    while len(parts) > 1:
        nxt = []
        for i in range(0, len(parts) - 1, 2):
            nxt.append(parts[i] + parts[i + 1])
        if len(parts) & 1:
            nxt.append(parts[-1])
        parts = nxt
    return parts[0]


def _pixelwise_loss_kernel(x_ref, protos_ref, labels_ref, acc_ref, *, hw,
                           tiles_per_p):
    # x_ref:      (1, C, TP)        native-layout embeddings (source dtype)
    # protos_ref: (K, C)            L2-normalized prototypes (same dtype as x)
    # labels_ref: (1, 1, TP)        int32 per-pixel class id
    # acc_ref:    (1, 1, 3, K, 128) per-(image, spatial-shard) per-lane sums
    #                               (0 = intersection, 1 = sum(probs), 2 = sum(onehot))
    @pl.when(pl.program_id(2) == 0)
    def _init():
        acc_ref[...] = jnp.zeros_like(acc_ref)

    x = x_ref[0]                        # (C, TP)  source dtype (bf16 stays bf16)
    pn = protos_ref[...]                # (K, C)   already L2-normalized
    lbl = labels_ref[0]                 # (1, TP)  int32

    K = pn.shape[0]
    TP = x.shape[1]
    nch = TP // 128

    # Cosine similarity numerator: MXU in source dtype, f32 accumulate.
    sims = jnp.dot(pn, x, preferred_element_type=jnp.float32)   # (K, TP)

    # 1/max(||x||, eps) via rsqrt on the EUP; norm math stays f32 (v5e-safe).
    xf = x.astype(jnp.float32)
    nrm2 = jnp.sum(xf * xf, axis=0, keepdims=True)              # (1, TP)
    inv_nrm = jax.lax.rsqrt(jnp.maximum(nrm2, EPS_NORM * EPS_NORM))
    sims = sims * inv_nrm

    # Valid-pixel mask for the ragged last tile (no wrapper-side padding of x).
    s_global = pl.program_id(1) * tiles_per_p + pl.program_id(2)
    col = jax.lax.broadcasted_iota(jnp.int32, (1, TP), 1) + s_global * TP
    valid_b = col < hw                                          # (1, TP) bool
    valid = valid_b.astype(jnp.float32)

    # Mask BEFORE the exp so garbage/NaN lanes cannot poison the softmax.
    sims = jnp.where(valid_b, sims, 0.0)

    # Softmax over the class (sublane) axis; denominator on the EUP.
    m = jnp.max(sims, axis=0, keepdims=True)
    e = jnp.exp(sims - m)
    s = jnp.sum(e, axis=0, keepdims=True)
    probs = e * (valid * pl.reciprocal(s, approx=True))         # 0 on invalid lanes

    # One-hot target from labels, zeroed on invalid lanes.
    cls = jax.lax.broadcasted_iota(jnp.int32, (K, TP), 0)
    onehot = ((cls == lbl) & valid_b).astype(jnp.float32)       # (K, TP)

    # Per-lane partial sums (tree-reduced): pure vreg-aligned VPU adds.
    acc_ref[0, 0, 0, :, :] += _lane_psum(probs * onehot, nch)   # dice intersection
    acc_ref[0, 0, 1, :, :] += _lane_psum(probs, nch)            # sum of probs
    acc_ref[0, 0, 2, :, :] += _lane_psum(onehot, nch)           # per-class true count


def base_pixelwise_loss(x, protos, labels, *, tile_hw=None):
    """x: (N, C, H, W) embeddings (f32 or bf16); protos: (K, C);
    labels: (N, H, W) int ground-truth class ids."""
    N, C, H, W = x.shape
    K = protos.shape[0]
    HW = H * W
    hw128 = ((HW + 127) // 128) * 128

    if tile_hw is None:
        # Large spatial tiles (HBM roofline); cap so the double-buffered x
        # stream stays well inside scoped VMEM on every generation.
        itemsize = jnp.dtype(x.dtype).itemsize
        cap = (8 * 1024 * 1024) // (2 * C * itemsize)
        cap = max(256, (cap // 128) * 128)
        tile_hw = min(8192, cap, hw128)
    tile_hw = max(128, (tile_hw // 128) * 128)

    n_sp = -(-HW // tile_hw)
    # v7x: give the second TensorCore parallel grid work when N < 2.
    P = 2 if (N < 2 and n_sp >= 2) else 1
    tiles_per_p = -(-n_sp // P)

    # Native layout: no NCHW->NHWC transpose, no padding copy, no dtype upcast.
    x_r = x.reshape(N, C, HW)
    lbl_r = labels.reshape(N, 1, HW).astype(jnp.int32)

    # Hoist prototype L2-normalization; feed the MXU in x's dtype.
    pn = protos.astype(jnp.float32)
    pn = pn / jnp.maximum(jnp.linalg.norm(pn, axis=-1, keepdims=True), EPS_NORM)
    pn = pn.astype(x.dtype)

    kernel = functools.partial(_pixelwise_loss_kernel, hw=HW,
                               tiles_per_p=tiles_per_p)

    def spatial_idx(p, s):
        # Clamp duplicated trailing tiles (when P does not divide n_sp) onto
        # the last real block; the in-kernel valid mask zeroes their output.
        return jnp.minimum(p * tiles_per_p + s, n_sp - 1)

    acc = pl.pallas_call(
        kernel,
        out_shape=jax.ShapeDtypeStruct((N, P, 3, K, 128), jnp.float32),
        grid_spec=pltpu.PrefetchScalarGridSpec(
            num_scalar_prefetch=0,
            grid=(N, P, tiles_per_p),
            in_specs=[
                pl.BlockSpec((1, C, tile_hw),
                             lambda n, p, s: (n, 0, spatial_idx(p, s))),
                pl.BlockSpec((K, C), lambda n, p, s: (0, 0)),
                pl.BlockSpec((1, 1, tile_hw),
                             lambda n, p, s: (n, 0, spatial_idx(p, s))),
            ],
            out_specs=pl.BlockSpec((1, 1, 3, K, 128),
                                   lambda n, p, s: (n, p, 0, 0, 0)),
        ),
        compiler_params=pltpu.CompilerParams(
            # batch + spatial-shard axes parallel (megacore / v7x dual-TC),
            # spatial reduction axis arbitrary (accumulator resident).
            dimension_semantics=("parallel", "parallel", "arbitrary")),
    )(x_r, pn, lbl_r)

    stats = jnp.sum(acc, axis=(0, 1, 4))            # (3, K)
    inter, psum, tsum = stats[0], stats[1], stats[2]
    card = psum + tsum                              # sum(probs) + sum(onehot)
    # soft_dice_score with smooth=0, eps=1e-7; aggregate = mean over classes.
    dice = (2.0 * inter) / jnp.maximum(card, EPS_DICE)
    loss = (1.0 - dice) * (tsum > 0).astype(jnp.float32)
    return jnp.mean(loss)


def base_pixelwise_loss_from_masks(x, protos, y_masks, **kw):
    """Convenience: accepts per-class binary masks (N, K, H, W) like the torch
    module; argmax(mask, dim=1) == label so semantics are identical."""
    labels = jnp.argmax(y_masks.astype(jnp.float32), axis=1)
    return base_pixelwise_loss(x, protos, labels, **kw)


def _reference_loss(x, protos, y_masks):
    """Pure-JAX mirror of the PyTorch forward (for sanity checking)."""
    N, C, H, W = x.shape
    K = protos.shape[0]
    out_flat = jnp.transpose(x, (0, 2, 3, 1)).reshape(-1, C).astype(jnp.float32)
    xn = out_flat / jnp.maximum(
        jnp.linalg.norm(out_flat, axis=-1, keepdims=True), EPS_NORM)
    pn = protos / jnp.maximum(
        jnp.linalg.norm(protos, axis=-1, keepdims=True), EPS_NORM)
    sims = xn @ pn.T
    collect_out = jnp.transpose(sims.reshape(N, H, W, K), (0, 3, 1, 2))
    probs = jax.nn.softmax(collect_out, axis=1)
    lbls = jnp.argmax(y_masks.astype(jnp.float32), axis=1)
    onehot = jnp.transpose(jax.nn.one_hot(lbls, K, dtype=jnp.float32),
                           (0, 3, 1, 2))
    y_pred = probs.reshape(N, K, -1)
    y_true = onehot.reshape(N, K, -1)
    inter = jnp.sum(y_pred * y_true, axis=(0, 2))
    card = jnp.sum(y_pred + y_true, axis=(0, 2))
    dice = 2.0 * inter / jnp.maximum(card, EPS_DICE)
    loss = 1.0 - dice
    loss = loss * (jnp.sum(y_true, axis=(0, 2)) > 0).astype(loss.dtype)
    return jnp.mean(loss)


if __name__ == "__main__":
    key = jax.random.PRNGKey(0)
    k_x, k_p, k_y = jax.random.split(key, 3)

    N, C, H, W, K = 2, 32, 16, 16, 4

    x = jax.random.normal(k_x, (N, C, H, W), dtype=jnp.float32)
    # deterministic "prototype" embeddings (one per target class)
    protos = jax.random.normal(k_p, (K, C), dtype=jnp.float32)
    # deterministic per-pixel ground-truth class ids + per-class binary masks
    labels = jax.random.randint(k_y, (N, H, W), 0, K)
    y_masks = jnp.transpose(jax.nn.one_hot(labels, K, dtype=jnp.float32),
                            (0, 3, 1, 2))                     # (N, K, H, W)

    loss = jax.block_until_ready(base_pixelwise_loss(x, protos, labels))
    ref = jax.block_until_ready(_reference_loss(x, protos, y_masks))

    assert jnp.isfinite(loss), "non-finite loss"
    assert abs(float(loss) - float(ref)) < 1e-2, (float(loss), float(ref))

    # Also exercise the N=1 path (spatial axis split across two parallel shards).
    loss1 = jax.block_until_ready(
        base_pixelwise_loss(x[:1], protos, labels[:1], tile_hw=128))
    ref1 = jax.block_until_ready(_reference_loss(x[:1], protos, y_masks[:1]))
    assert abs(float(loss1) - float(ref1)) < 1e-2, (float(loss1), float(ref1))

    print("KERNEL_OK")
</pallas_src>

<mosaic_0001>
module attributes {stable_mosaic.version = 11 : i64} {
  func.func @_pixelwise_loss_kernel(%arg0: i32, %arg1: i32, %arg2: i32, %arg3: memref<1x32x256xf32, #tpu.memory_space<vmem>>, %arg4: memref<4x32xf32, #tpu.memory_space<vmem>>, %arg5: memref<1x1x256xi32, #tpu.memory_space<vmem>>, %arg6: memref<1x1x3x4x128xf32, #tpu.memory_space<vmem>>) attributes {dimension_semantics = [#tpu.dimension_semantics<parallel>, #tpu.dimension_semantics<parallel>, #tpu.dimension_semantics<arbitrary>], iteration_bounds = array<i64: 2, 1, 1>, scalar_prefetch = 0 : i64, scratch_operands = 0 : i64, tpu.core_type = #tpu.core_type<tc>, window_params = [{transform_indices = @transform_0, window_bounds = array<i64: 1, 32, 256>}, {pipeline_mode = #tpu.pipeline_mode<synchronous>, transform_indices = @transform_1, window_bounds = array<i64: 4, 32>}, {transform_indices = @transform_2, window_bounds = array<i64: 1, 1, 256>}, {transform_indices = @transform_3, window_bounds = array<i64: 1, 1, 3, 4, 128>}]} {
    %c0_i32 = arith.constant 0 : i32
    %0 = arith.cmpi eq, %arg2, %c0_i32 : i32
    %1 = arith.extui %0 : i1 to i32
    %c0_i32_0 = arith.constant 0 : i32
    %2 = arith.cmpi ne, %1, %c0_i32_0 : i32
    scf.if %2 {
      %cst_42 = arith.constant 0.000000e+00 : f32
      %77 = vector.broadcast %cst_42 : f32 to vector<1x1x3x4x128xf32>
      %c0_43 = arith.constant 0 : index
      %c0_44 = arith.constant 0 : index
      %c0_45 = arith.constant 0 : index
      %c0_46 = arith.constant 0 : index
      %c0_47 = arith.constant 0 : index
      %78 = vector.load %arg6[%c0_43, %c0_44, %c0_45, %c0_46, %c0_47] : memref<1x1x3x4x128xf32, #tpu.memory_space<vmem>>, vector<1x1x3x4x128xf32>
      tpu.vector_store %arg6[%c0_43, %c0_44, %c0_45, %c0_46, %c0_47], %77 {strides = array<i32>} : memref<1x1x3x4x128xf32, #tpu.memory_space<vmem>>, vector<1x1x3x4x128xf32>,
    } else {
    }
    %c0 = arith.constant 0 : index
    %c0_1 = arith.constant 0 : index
    %c0_2 = arith.constant 0 : index
    %3 = vector.load %arg3[%c0, %c0_1, %c0_2] : memref<1x32x256xf32, #tpu.memory_space<vmem>>, vector<1x32x256xf32>
    %4 = vector.shape_cast %3 : vector<1x32x256xf32> to vector<32x256xf32>
    %c0_3 = arith.constant 0 : index
    %c0_4 = arith.constant 0 : index
    %5 = vector.load %arg4[%c0_3, %c0_4] : memref<4x32xf32, #tpu.memory_space<vmem>>, vector<4x32xf32>
    %c0_5 = arith.constant 0 : index
    %c0_6 = arith.constant 0 : index
    %c0_7 = arith.constant 0 : index
    %6 = vector.load %arg5[%c0_5, %c0_6, %c0_7] : memref<1x1x256xi32, #tpu.memory_space<vmem>>, vector<1x1x256xi32>
    %7 = vector.shape_cast %6 : vector<1x1x256xi32> to vector<1x256xi32>
    %cst = arith.constant dense<0.000000e+00> : vector<4x256xf32>
    %8 = tpu.matmul %5, %4, %cst {dimension_numbers = #tpu.dot_dimension_numbers<[1], [0], [0], [1], [0, 0, 1, 1], [], []>} : vector<4x32xf32>, vector<32x256xf32>, vector<4x256xf32> -> vector<4x256xf32>
    %9 = arith.mulf %4, %4 : vector<32x256xf32>
    %cst_8 = arith.constant dense<0.000000e+00> : vector<256xf32>
    %10 = vector.multi_reduction <add>, %9, %cst_8 [0] : vector<32x256xf32> to vector<256xf32>
    %11 = vector.shape_cast %10 : vector<256xf32> to vector<1x256xf32>
    %cst_9 = arith.constant 1.000000e-24 : f32
    %12 = vector.broadcast %cst_9 : f32 to vector<1x256xf32>
    %13 = arith.maximumf %11, %12 : vector<1x256xf32>
    %14 = math.rsqrt %13 : vector<1x256xf32>
    %15 = vector.broadcast %14 : vector<1x256xf32> to vector<4x256xf32>
    %16 = arith.mulf %8, %15 : vector<4x256xf32>
    %c1_i32 = arith.constant 1 : i32
    %17 = arith.muli %arg1, %c1_i32 : i32
    %18 = arith.addi %17, %arg2 : i32
    %19 = tpu.iota {dimensions = array<i32: 1>} : vector<1x256xi32>
    %c256_i32 = arith.constant 256 : i32
    %20 = arith.muli %18, %c256_i32 : i32
    %21 = vector.broadcast %20 : i32 to vector<1x256xi32>
    %22 = arith.addi %19, %21 : vector<1x256xi32>
    %c256_i32_10 = arith.constant 256 : i32
    %23 = vector.broadcast %c256_i32_10 : i32 to vector<1x256xi32>
    %24 = arith.cmpi slt, %22, %23 : vector<1x256xi32>
    %25 = arith.extui %24 : vector<1x256xi1> to vector<1x256xi32>
    %26 = arith.sitofp %25 : vector<1x256xi32> to vector<1x256xf32>
    %cst_11 = arith.constant 0.000000e+00 : f32
    %27 = vector.shape_cast %24 : vector<1x256xi1> to vector<1x256xi1>
    %28 = vector.broadcast %27 : vector<1x256xi1> to vector<4x256xi1>
    %29 = vector.broadcast %cst_11 : f32 to vector<4x256xf32>
    %30 = arith.select %28, %16, %29 : vector<4x256xi1>, vector<4x256xf32>
    %cst_12 = arith.constant dense<0xFF800000> : vector<256xf32>
    %31 = vector.multi_reduction <maximumf>, %30, %cst_12 [0] : vector<4x256xf32> to vector<256xf32>
    %32 = vector.shape_cast %31 : vector<256xf32> to vector<1x256xf32>
    %33 = vector.broadcast %32 : vector<1x256xf32> to vector<4x256xf32>
    %34 = arith.subf %30, %33 : vector<4x256xf32>
    %35 = math.exp %34 : vector<4x256xf32>
    %cst_13 = arith.constant dense<0.000000e+00> : vector<256xf32>
    %36 = vector.multi_reduction <add>, %35, %cst_13 [0] : vector<4x256xf32> to vector<256xf32>
    %37 = vector.shape_cast %36 : vector<256xf32> to vector<1x256xf32>
    %38 = tpu.reciprocal %37 {approx = true} : vector<1x256xf32> -> vector<1x256xf32>
    %39 = arith.mulf %26, %38 : vector<1x256xf32>
    %40 = vector.broadcast %39 : vector<1x256xf32> to vector<4x256xf32>
    %41 = arith.mulf %35, %40 : vector<4x256xf32>
    %42 = tpu.iota {dimensions = array<i32: 0>} : vector<4x256xi32>
    %43 = vector.broadcast %7 : vector<1x256xi32> to vector<4x256xi32>
    %44 = arith.cmpi eq, %42, %43 : vector<4x256xi32>
    %45 = vector.broadcast %24 : vector<1x256xi1> to vector<4x256xi1>
    %46 = arith.andi %44, %45 : vector<4x256xi1>
    %47 = arith.extui %46 : vector<4x256xi1> to vector<4x256xi32>
    %48 = arith.sitofp %47 : vector<4x256xi32> to vector<4x256xf32>
    %c0_14 = arith.constant 0 : index
    %c0_15 = arith.constant 0 : index
    %c0_16 = arith.constant 0 : index
    %c0_17 = arith.constant 0 : index
    %c0_18 = arith.constant 0 : index
    %49 = vector.load %arg6[%c0_14, %c0_15, %c0_16, %c0_17, %c0_18] : memref<1x1x3x4x128xf32, #tpu.memory_space<vmem>>, vector<1x1x1x4x128xf32>
    %50 = vector.shape_cast %49 : vector<1x1x1x4x128xf32> to vector<4x128xf32>
    %51 = arith.mulf %41, %48 : vector<4x256xf32>
    %52 = vector.extract_strided_slice %51 {offsets = [0, 0], sizes = [4, 128], strides = [1, 1]} : vector<4x256xf32> to vector<4x128xf32>
    %53 = vector.extract_strided_slice %51 {offsets = [0, 128], sizes = [4, 128], strides = [1, 1]} : vector<4x256xf32> to vector<4x128xf32>
    %54 = arith.addf %52, %53 : vector<4x128xf32>
    %55 = arith.addf %50, %54 : vector<4x128xf32>
    %c0_19 = arith.constant 0 : index
    %c0_20 = arith.constant 0 : index
    %c0_21 = arith.constant 0 : index
    %c0_22 = arith.constant 0 : index
    %c0_23 = arith.constant 0 : index
    %56 = vector.load %arg6[%c0_19, %c0_20, %c0_21, %c0_22, %c0_23] : memref<1x1x3x4x128xf32, #tpu.memory_space<vmem>>, vector<1x1x1x4x128xf32>
    %57 = vector.shape_cast %56 : vector<1x1x1x4x128xf32> to vector<4x128xf32>
    %58 = vector.shape_cast %55 : vector<4x128xf32> to vector<1x1x1x4x128xf32>
    tpu.vector_store %arg6[%c0_19, %c0_20, %c0_21, %c0_22, %c0_23], %58 {strides = array<i32>} : memref<1x1x3x4x128xf32, #tpu.memory_space<vmem>>, vector<1x1x1x4x128xf32>,
    %c0_24 = arith.constant 0 : index
    %c0_25 = arith.constant 0 : index
    %c1 = arith.constant 1 : index
    %c0_26 = arith.constant 0 : index
    %c0_27 = arith.constant 0 : index
    %59 = vector.load %arg6[%c0_24, %c0_25, %c1, %c0_26, %c0_27] : memref<1x1x3x4x128xf32, #tpu.memory_space<vmem>>, vector<1x1x1x4x128xf32>
    %60 = vector.shape_cast %59 : vector<1x1x1x4x128xf32> to vector<4x128xf32>
    %61 = vector.extract_strided_slice %41 {offsets = [0, 0], sizes = [4, 128], strides = [1, 1]} : vector<4x256xf32> to vector<4x128xf32>
    %62 = vector.extract_strided_slice %41 {offsets = [0, 128], sizes = [4, 128], strides = [1, 1]} : vector<4x256xf32> to vector<4x128xf32>
    %63 = arith.addf %61, %62 : vector<4x128xf32>
    %64 = arith.addf %60, %63 : vector<4x128xf32>
    %c0_28 = arith.constant 0 : index
    %c0_29 = arith.constant 0 : index
    %c1_30 = arith.constant 1 : index
    %c0_31 = arith.constant 0 : index
    %c0_32 = arith.constant 0 : index
    %65 = vector.load %arg6[%c0_28, %c0_29, %c1_30, %c0_31, %c0_32] : memref<1x1x3x4x128xf32, #tpu.memory_space<vmem>>, vector<1x1x1x4x128xf32>
    %66 = vector.shape_cast %65 : vector<1x1x1x4x128xf32> to vector<4x128xf32>
    %67 = vector.shape_cast %64 : vector<4x128xf32> to vector<1x1x1x4x128xf32>
    tpu.vector_store %arg6[%c0_28, %c0_29, %c1_30, %c0_31, %c0_32], %67 {strides = array<i32>} : memref<1x1x3x4x128xf32, #tpu.memory_space<vmem>>, vector<1x1x1x4x128xf32>,
    %c0_33 = arith.constant 0 : index
    %c0_34 = arith.constant 0 : index
    %c2 = arith.constant 2 : index
    %c0_35 = arith.constant 0 : index
    %c0_36 = arith.constant 0 : index
    %68 = vector.load %arg6[%c0_33, %c0_34, %c2, %c0_35, %c0_36] : memref<1x1x3x4x128xf32, #tpu.memory_space<vmem>>, vector<1x1x1x4x128xf32>
    %69 = vector.shape_cast %68 : vector<1x1x1x4x128xf32> to vector<4x128xf32>
    %70 = vector.extract_strided_slice %48 {offsets = [0, 0], sizes = [4, 128], strides = [1, 1]} : vector<4x256xf32> to vector<4x128xf32>
    %71 = vector.extract_strided_slice %48 {offsets = [0, 128], sizes = [4, 128], strides = [1, 1]} : vector<4x256xf32> to vector<4x128xf32>
    %72 = arith.addf %70, %71 : vector<4x128xf32>
    %73 = arith.addf %69, %72 : vector<4x128xf32>
    %c0_37 = arith.constant 0 : index
    %c0_38 = arith.constant 0 : index
    %c2_39 = arith.constant 2 : index
    %c0_40 = arith.constant 0 : index
    %c0_41 = arith.constant 0 : index
    %74 = vector.load %arg6[%c0_37, %c0_38, %c2_39, %c0_40, %c0_41] : memref<1x1x3x4x128xf32, #tpu.memory_space<vmem>>, vector<1x1x1x4x128xf32>
    %75 = vector.shape_cast %74 : vector<1x1x1x4x128xf32> to vector<4x128xf32>
    %76 = vector.shape_cast %73 : vector<4x128xf32> to vector<1x1x1x4x128xf32>
    tpu.vector_store %arg6[%c0_37, %c0_38, %c2_39, %c0_40, %c0_41], %76 {strides = array<i32>} : memref<1x1x3x4x128xf32, #tpu.memory_space<vmem>>, vector<1x1x1x4x128xf32>,
    return
  }
  func.func @transform_0(%arg0: i32, %arg1: i32, %arg2: i32) -> (i32, i32, i32) {
    %c1_i32 = arith.constant 1 : i32
    %0 = arith.muli %arg1, %c1_i32 : i32
    %1 = arith.addi %0, %arg2 : i32
    %c0_i32 = arith.constant 0 : i32
    %2 = arith.minsi %1, %c0_i32 : i32
    %c0_i32_0 = arith.constant 0 : i32
    %c0_i32_1 = arith.constant 0 : i32
    return %arg0, %c0_i32_0, %2 : i32, i32, i32
  }
  func.func @transform_1(%arg0: i32, %arg1: i32, %arg2: i32) -> (i32, i32) {
    %c0_i32 = arith.constant 0 : i32
    %c0_i32_0 = arith.constant 0 : i32
    %c0_i32_1 = arith.constant 0 : i32
    return %c0_i32, %c0_i32_0 : i32, i32
  }
  func.func @transform_2(%arg0: i32, %arg1: i32, %arg2: i32) -> (i32, i32, i32) {
    %c1_i32 = arith.constant 1 : i32
    %0 = arith.muli %arg1, %c1_i32 : i32
    %1 = arith.addi %0, %arg2 : i32
    %c0_i32 = arith.constant 0 : i32
    %2 = arith.minsi %1, %c0_i32 : i32
    %c0_i32_0 = arith.constant 0 : i32
    %c0_i32_1 = arith.constant 0 : i32
    return %arg0, %c0_i32_0, %2 : i32, i32, i32
  }
  func.func @transform_3(%arg0: i32, %arg1: i32, %arg2: i32) -> (i32, i32, i32, i32, i32) {
    %c0_i32 = arith.constant 0 : i32
    %c0_i32_0 = arith.constant 0 : i32
    %c0_i32_1 = arith.constant 0 : i32
    %c0_i32_2 = arith.constant 0 : i32
    return %arg0, %arg1, %c0_i32, %c0_i32_0, %c0_i32_1 : i32, i32, i32, i32, i32
  }
}

</mosaic_0001>

<bundles_post_ra>
// kernel: tpu_custom_call.1
= control target key start
LH: loop header
LB: loop body
LE: loop exit
PB: predicated region body
PF: predicated region fallthrough
CT: control target
= control target key end

     0   :  { %8 = vsyncpa [#allocation3], 0  ;;  %s1190_s0 = inlined_call_operand.hbm [shape: f32[2,32,256], index: 0, kind: input, shape index: {}]   ;;  %s1191_s1 = inlined_call_operand.hbm [shape: f32[4,32], index: 1, kind: input, shape index: {}]   ;;  %s1192_s2 = inlined_call_operand.vmem [shape: s32[2,1,256], index: 2, kind: input, shape index: {}]   ;;  %s1193_s3 = inlined_call_operand.hbm [shape: f32[2,1,3,4,128], index: 3, kind: output, shape index: {}]  }
   0x1   :  { %10 = vsyncpa [#allocation3 + $0x1], 0 }
   0x2   :  { %11 = vsyncpa [#allocation6], 0 }
   0x3   :  { %12 = vsyncpa [#allocation4], 0 }
   0x4   :  { %14 = vsyncpa [#allocation4 + $0x1], 0  ;;  %s939_s12 = smov 0   ;;  %s941_s13 = smov 0  }
   0x5   :  { %s943_s14 = smov 0   ;;  %s945_s15 = smov 0  }
   0x6   :  { %s947_s16 = smov 0   ;;  %s949_s17 = smov 0  }
   0x7 LB: > { %s642_s18 = sadd.s32 4294967295, %s909_s17   ;;  %s643_s19 = sadd.s32 4294967294, %s909_s17   ;;  %s909_s17 = sphi %s949_s17, %s20_s17   ;;  %s905_s16 = sphi %s947_s16, %s1221_s16   ;;  %s901_s15 = sphi %s945_s15, %s1220_s15   ;;  %s897_s14 = sphi %s943_s14, %s1219_s14   ;;  %s893_s13 = sphi %s941_s13, %s1218_s13   ;;  %s889_s12 = sphi %s939_s12, %s1217_s12  }
   0x8   : > { %s54_s20 = sadd.s32 1, %s897_s14  ;;  %p61_p0 = scmp.ne.s32.totalorder %s897_s14, %s893_s13 }
   0x9   : > { %p62_p1 = scmp.eq.s32.totalorder %s909_s17, 0  ;;  %p67_p2 = scmp.ne.s32.totalorder %s893_s13, %s889_s12 }
   0xa   : > { %p977_p3 = scmp.eq.s32.totalorder %s642_s18, 0  ;;  %p148_p4 = scmp.eq.s32.totalorder %s642_s18, 1 }
   0xb   : > { %p981_p5 = por %p62_p1, %p61_p0  ;;  %p154_p6 = scmp.eq.s32.totalorder %s643_s19, 1 }
   0xc   : > { %s1200_s21 = scalar_select %p977_p3, 1, 0 }
   0xd   : > { %p987_p7 = por %p977_p3, %p67_p2  ;;  %p991_p8 = por %p148_p4, %p61_p0 }
   0xe   : > { %p995_p9 = por %p154_p6, %p67_p2  ;;  %p644_p10 = scmp.ge.s32.totalorder %s909_s17, 1 }
   0xf   : > { %s1202_s23 = scalar_select %p987_p7, 1, 0 }
  0x10   : > { %s1203_s24 = scalar_select %p991_p8, 1, 0 }
  0x11   : > { %s1204_s25 = scalar_select %p995_p9, 1, 0 }
  0x12   : > { %p161_p11 = scmp.lt.s32.totalorder %s909_s17, 3  ;;  %s911_s27 = smov [#allocation5]  }
  0x13   : > { %s174_s28 = sshll.u32 %s911_s27, 4  ;;  %p696_p1 = scmp.lt.s32.totalorder %s909_s17, 2  ;;  %s175_s28 = int_to_ptr.vmem [resolvable:$true] %s174_s28 }
  0x14   : > { %p1002_p13 = pnand %p644_p10, %p161_p11  ;;  %s39_s4 = sadd.s32 1, %s905_s16 }
  0x15   : > { %p1011_p4 = pnand %p696_p1, %p981_p5  ;;  %p1022_p6 = scmp.ge.s32.totalorder %s39_s4, 2 }
  0x16   : > { %s1205_s26 = scalar_select %p1002_p13, 1, 0 }
  0x17   : > { %p683_p0 = pneg %p1002_p13  ;;  %s185_s6 = sand.u32 1, %s897_s14  }
  0x18   : > { %s1206_s29 = scalar_select %p1011_p4, 1, 0 }
  0x19   : > { %p1017_p2 = pnand %p683_p0, %p977_p3  ;;  %s765_s9 = scalar_lea.hbm %s1191_s1, 64 }
  0x1a   : > { %s1208_s5 = scalar_select %p1022_p6, 1, 0 }
  0x1b   : > { %p766_p5 = scmp.ne.s32.totalorder %s1191_s1, %s765_s9  ;;  %p767_p10 = pneg %p1017_p2 }
  0x1c   : > { %p772_p0 = scmp.lt.u32.totalorder %s765_s9, %s1191_s1 }
  0x1d   : > { %p768_p11 = pnand %p767_p10, %p766_p5 }
  0x1f   : > { %p769_p1 = pneg %p768_p11 }
  0x21   : > { %p774_p12 = pnand %p772_p0, %p769_p1 }
  0x23   : > { %777 = shalt.err (!%p774_p12)
}
  0x24   : > { %s778_s22 = scalar_lea.vmem %s175_s28, 64  ;;  %p786_p7 = scmp.lt.s32.totalorder %s175_s28, %s175_s28 }
  0x25   : > { %p779_p9 = scmp.ne.s32.totalorder %s175_s28, %s778_s22  ;;  %p787_p13 = scmp.lt.s32.totalorder %s778_s22, %s778_s22 }
  0x27   : > { %p781_p8 = pnand %p779_p9, %p767_p10  ;;  %p788_p4 = por %p787_p13, %p786_p7 }
  0x29   : > { %p782_p3 = pneg %p781_p8 }
  0x2b   : > { %p789_p6 = pnand %p788_p4, %p782_p3 }
  0x2d   : > { %792 = shalt.err (!%p789_p6)
}
  0x2e   : > { %686 = dma.hbm_to_vmem [thread:$0]  (!%p1017_p2), %s1191_s1, 64, %s175_s28, [#allocation6]  }
  0x2f   : > { %p1209_p9 = scmp.ne.s32.totalorder %s1208_s5, 0  ;;  %s647_s8 = sshll.u32 %s185_s6, 6 }
  0x30   : > { %s664_s10 = sshll.u32 %s905_s16, 10  ;;  %s189_s19 = scalar_lea.vmem [#allocation2], %s647_s8 }
  0x31   : > { %s1223_s4 = smov (%p1209_p9, %s39_s4), 0  ;;  %s1053_s18 = scalar_lea.hbm %s1190_s0, %s664_s10 }
  0x32   : > { %s49_s9 = ssub.s32 %s905_s16, %s1223_s4  ;;  %s201_s22 = sshll.u32 %s189_s19, 4  ;;  %s1060_s22 = int_to_ptr.vmem [resolvable:$true] %s201_s22 }
  0x33   : > { %p52_p3 = scmp.eq.s32.totalorder %s49_s9, 0  ;;  %s1062_s5 = scalar_lea.sflag [#allocation3], %s185_s6 }
  0x34   : > { %s793_s27 = scalar_lea.hbm %s1053_s18, 1024  ;;  %p1210_p8 = scmp.ne.s32.totalorder %s1206_s29, 0 }
  0x35   : > { %s1058_s28 = scalar_select %p52_p3, %s897_s14, %s54_s20  }
  0x36   : > { %p794_p7 = scmp.ne.s32.totalorder %s1053_s18, %s793_s27  ;;  %p795_p12 = pneg %p1210_p8 }
  0x37   : > { %s798_s8 = scalar_lea.hbm %s1190_s0, 2048  ;;  %p799_p2 = scmp.lt.u32.totalorder %s1053_s18, %s1190_s0 }
  0x38   : > { %p796_p13 = pnand %p795_p12, %p794_p7  ;;  %p800_p6 = scmp.lt.u32.totalorder %s798_s8, %s793_s27 }
  0x39   : > { %p802_p10 = scmp.lt.u32.totalorder %s793_s27, %s1053_s18 }
  0x3a   : > { %p797_p4 = pneg %p796_p13  ;;  %p801_p5 = por %p800_p6, %p799_p2 }
  0x3c   : > { %p803_p11 = por %p802_p10, %p801_p5 }
  0x3e   : > { %p804_p1 = pnand %p803_p11, %p797_p4 }
  0x40   : > { %807 = shalt.err (!%p804_p1)
}
  0x41   : > { %s808_s20 = scalar_lea.vmem %s1060_s22, 1024  ;;  %s912_s6 = smov [#allocation2]  }
  0x42   : > { %p809_p0 = scmp.ne.s32.totalorder %s1060_s22, %s808_s20  ;;  %s813_s11 = sshll.u32 %s912_s6, 4  ;;  %s814_s11 = int_to_ptr.vmem [resolvable:$false] %s813_s11 }
  0x43   : > { %s815_s19 = scalar_lea.vmem %s814_s11, 2048  ;;  %p816_p7 = scmp.lt.s32.totalorder %s1060_s22, %s814_s11 }
  0x44   : > { %p811_p9 = pnand %p809_p0, %p795_p12  ;;  %p817_p13 = scmp.lt.s32.totalorder %s815_s19, %s808_s20 }
  0x46   : > { %p812_p3 = pneg %p811_p9  ;;  %p818_p2 = por %p817_p13, %p816_p7 }
  0x48   : > { %p819_p6 = pnand %p818_p2, %p812_p3 }
  0x4a   : > { %822 = shalt.err (!%p819_p6)
}
  0x4b   : > { %s913_s27 = smov 256   ;;  %s914_s7 = smov 16  }
  0x4c   : > { %690 = dma.hbm_to_vmem [thread:$0]  (!%p1210_p8), %s1053_s18, 1024, %s1060_s22, %s1062_s5, %s913_s27, %s913_s27, %s914_s7  }
  0x4d   : > { %p1211_p12 = scmp.ne.s32.totalorder %s1205_s26, 0 }
  0x4e   : > { %s1093_s9 = sand.u32 (!%p1211_p12), 1, %s893_s13   ;;  %p1212_p4 = scmp.ne.s32.totalorder (!%p1211_p12), %s1202_s23, 0 }
  0x4f   : > { %231 = sbr.rel (%p1211_p12) target bundleno = 391 (0x187), region = 32  ;;  %s651_s8 = sshll.u32 (!%p1211_p12), %s1093_s9, 6 }
  0x50   : > { %s234_s10 = scalar_lea.sflag (!%p1211_p12), [#allocation3], %s1093_s9  ;;  %s237_s30 = scalar_lea.vmem (!%p1211_p12), [#allocation2], %s651_s8 }
  0x56   : > { %876 = dma.done.wait (%p1212_p4), %s234_s10, 1024  }
  0x57   : > { %878 = vsyncadd (%p1212_p4), %s234_s10, 4294966272  ;;  %p1213_p5 = scmp.ne.s32.totalorder %s1200_s21, 0 }
  0x59   : > { %880 = dma.done.wait (%p1213_p5), [#allocation6], 64  }
  0x5a   : > { %882 = vsyncadd (%p1213_p5), [#allocation6], 4294967232  ;;  %s673_s26 = smul.u32 12, %s1093_s9  ;;  %v915_v0 = vmov 0.0   ;;  %v302_v1 = vld [vmem:[%s237_s30 + $0x8] sm:$0xff]  ;;  %v304_v2 = vld [vmem:[%s237_s30 + $0x18] sm:$0xff]  ;;  %v477_v28 = vlaneseq }
  0x5b   : > { %379 = vmatprep.mubr.f32.mxu0 %v915_v0  ;;  %v301_v3 = vld [vmem:[%s237_s30] sm:$0xff]  ;;  %v665_v4 = vpack.c.bf16 %v304_v2, %v302_v1  ;;  %v387_v5 = vmul.f32 %v302_v1, %v302_v1  ;;  %v389_v6 = vmul.f32 %v304_v2, %v304_v2  ;;  %v303_v7 = vld [vmem:[%s237_s30 + $0x10] sm:$0xff]  ;;  %v306_v9 = vld [vmem:[%s237_s30 + $0x28] sm:$0xff]  ;;  %vm311_vm0 = vcmask 261120   ;;  %p283_p8 = scmp.lt.s32.totalorder %s901_s15, 1  ;;  %s674_s20 = smul.u32 192, %s901_s15 }
  0x5c   : > { %s1106_s29 = scalar_lea.vmem [#allocation7], %s673_s26  ;;  %v386_v8 = vmul.f32 %v301_v3, %v301_v3  ;;  %v308_v10 = vld [vmem:[%s237_s30 + $0x38] sm:$0xff]  ;;  %v667_v11 = vpack.c.bf16 %v303_v7, %v301_v3  ;;  %v388_v12 = vmul.f32 %v303_v7, %v303_v7  ;;  %v391_v14 = vmul.f32 %v306_v9, %v306_v9  ;;  %v305_v15 = vld [vmem:[%s237_s30 + $0x20] sm:$0xff]  ;;  %v307_v16 = vld [vmem:[%s237_s30 + $0x30] sm:$0xff]  ;;  %p1214_p11 = scmp.ne.s32.totalorder %s1203_s24, 0 }
  0x5d   : > { %298 = vst [vmem:[%s1106_s29] sm:$0xf] %v915_v0  ;;  %299 = vst [vmem:[%s1106_s29 + $0x4] sm:$0xf] %v915_v0  ;;  %v669_v13 = vpack.c.bf16 %v308_v10, %v306_v9  ;;  %666 = vmatprep.subr.bf16.mxu0 %v665_v4  ;;  %v403_v17 = vadd.f32 %v389_v6, %v387_v5  ;;  %v393_v18 = vmul.f32 %v308_v10, %v308_v10  ;;  %v309_v27 = vld [vmem:[#allocation5] sm:$0xf]  ;;  %s284_s21 = scalar_select %p283_p8, %s901_s15, 1 }
  0x5e   : > { %300 = vst [vmem:[%s1106_s29 + $0x8] sm:$0xf] %v915_v0  ;;  %v390_v19 = vmul.f32 %v305_v15, %v305_v15  ;;  %668 = vmatpush1.bf16.msra.mxu0 %v667_v11  ;;  %v394_v20 = vadd.f32 %v388_v12, %v386_v8  ;;  %v671_v21 = vpack.c.bf16 %v307_v16, %v305_v15  ;;  %v478_v29 = vshrl.u32 %v477_v28, 7  ;;  %s527_s6 = sshll.u32 %s1106_s29, 4  ;;  %s1137_s27 = scalar_lea.hbm %s1193_s3, %s674_s20  ;;  %s1139_s6 = int_to_ptr.vmem [resolvable:$true] %s527_s6 }
  0x5f   : > { %v392_v22 = vmul.f32 %v307_v16, %v307_v16  ;;  %670 = vmatprep.subr.bf16.mxu0 %v669_v13  ;;  %v404_v23 = vadd.f32 %v403_v17, %v391_v14  ;;  %s653_s23 = sshll.u32 %s284_s21, 1  ;;  %vm436_vm3 = vcmask 1043456   ;;  %s512_s15 = scalar_lea.sflag [#allocation4], %s1093_s9 }
  0x60   : > { %v395_v24 = vadd.f32 %v394_v20, %v390_v19  ;;  %s289_s5 = scalar_lea.vmem %s1192_s2, %s653_s23  ;;  %v481_v31 = vsub.s32 0, %v478_v29  ;;  %v485_v32 = vsub.s32 1, %v478_v29  ;;  %s823_s7 = scalar_lea.vmem %s1139_s6, 192 }
  0x61   : > { %v405_v25 = vadd.f32 %v404_v23, %v393_v18  ;;  %v310_v30 = vld [vmem:[%s289_s5] sm:$0x3]  ;;  %p824_p10 = scmp.ne.s32.totalorder %s1139_s6, %s823_s7  ;;  %s916_s8 = smov [#allocation7]  }
  0x62   : > { %672 = vmatpush1.bf16.msra.mxu0 %v671_v21  ;;  %v396_v26 = vadd.f32 %v395_v24, %v392_v22  ;;  %v482_v33 = vrot.slane %v310_v30, %v481_v31  ;;  %v486_v34 = vrot.slane %v310_v30, %v485_v32  ;;  %s827_s10 = sshll.u32 %s916_s8, 4  ;;  %s828_s10 = int_to_ptr.vmem [resolvable:$false] %s827_s10 }
  0x63   : > { %v406_v41 = vrot.slane %v405_v25, 4  ;;  %p825_p1 = pnand %p824_p10, %p1214_p11  ;;  %s829_s30 = scalar_lea.vmem %s828_s10, 384 }
  0x64   : > { %vm487_vm1 = vcmp.eq.s32.totalorder %v478_v29, %v482_v33  ;;  %vm488_vm2 = vcmp.eq.s32.totalorder %v478_v29, %v486_v34  ;;  %v397_v40 = vrot.slane %v396_v26, 4  ;;  %p830_p9 = scmp.lt.s32.totalorder %s1139_s6, %s828_s10  ;;  %p831_p3 = scmp.lt.s32.totalorder %s829_s30, %s823_s7 }
  0x65   : > { %654 = vmatmul.mubr.msk.f32.vlgmr.msra.gmra.mrb[0].mxu0 %vm311_vm0, %v309_v27  ;;  %v1116_v35 = vsel %vm487_vm1, 1.0, %v915_v0  ;;  %v1118_v36 = vsel %vm488_vm2, 1.0, %v915_v0  ;;  %v659_v38 = vld [vmem:[%s1106_s29 + $0x8] sm:$0xf]  ;;  %v407_v43 = vadd.f32 %v406_v41, %v405_v25  ;;  %p826_p0 = pneg %p825_p1 }
  0x66   : > { %v508_v37 = vadd.f32 %v1118_v36, %v1116_v35  ;;  %v398_v42 = vadd.f32 %v397_v40, %v396_v26  ;;  %v495_v40 = vld [vmem:[%s1106_s29] sm:$0xf]  ;;  %p832_p7 = por %p831_p3, %p830_p9 }
  0x67   : > { %v408_v45 = vrot.slane %v407_v43, 2 }
  0x68   : > { %v509_v39 = vadd.f32 %v659_v38, %v508_v37  ;;  %v399_v44 = vrot.slane %v398_v42, 2  ;;  %v657_v37 = vld [vmem:[%s1106_s29 + $0x4] sm:$0xf]  ;;  %p833_p13 = pnand %p832_p7, %p826_p0 }
  0x69   : > { %v409_v47 = vadd.f32 %v408_v45, %v407_v43 }
  0x6a   : > { %660 = vst [vmem:[%s1106_s29 + $0x8] sm:$0xf] %v509_v39  ;;  %v400_v46 = vadd.f32 %v399_v44, %v398_v42 }
  0x6b   : > { %v410_v49 = vrot.slane %v409_v47, 1 }
  0x6c   : > { %v401_v48 = vrot.slane %v400_v46, 1 }
  0x6d   : > { %v411_v51 = vadd.f32 %v410_v49, %v409_v47 }
  0x6e   : > { %v402_v50 = vadd.f32 %v401_v48, %v400_v46 }
  0x6f   : > { %v413_v53 = vmax.f32 %v411_v51, 1e-24 }
  0x70   : > { %v412_v52 = vmax.f32 %v402_v50, 1e-24 }
  0x72   : > { %753 = vrsqrt.f32 %v412_v52 }
  0x73   : > { %755 = vrsqrt.f32 %v413_v53 }
  0x7c   : > { %v754_v54 = vpop.eup %753 }
  0x7d   : > { %v756_v55 = vpop.eup %755 }
 0x138   : > { %v381_v56 = vpop.f32.mrb[0].mxu0 }
 0x139   : > { %v416_v57 = vmul.f32 %v754_v54, %v381_v56  ;;  %v383_v58 = vpop.f32.mrb[1].mxu0 }
 0x13a   : > { %v417_v59 = vmul.f32 %v756_v55, %v383_v58 }
 0x13b   : > { %v437_v60 = vsel %vm436_vm3, %v416_v57, -inf }
 0x13c   : > { %v438_v61 = vrot.slane %v437_v60, 4  ;;  %v444_v62 = vsel %vm436_vm3, %v417_v59, -inf }
 0x13d   : > { %v445_v63 = vrot.slane %v444_v62, 4 }
 0x13e   : > { %v439_v0 = vmax.f32 %v437_v60, %v438_v61 }
 0x13f   : > { %v446_v1 = vmax.f32 %v444_v62, %v445_v63 }
 0x140   : > { %v440_v2 = vrot.slane %v439_v0, 2 }
 0x141   : > { %v447_v3 = vrot.slane %v446_v1, 2 }
 0x142   : > { %v441_v4 = vmax.f32 %v439_v0, %v440_v2 }
 0x143   : > { %v448_v5 = vmax.f32 %v446_v1, %v447_v3 }
 0x144   : > { %v442_v6 = vrot.slane %v441_v4, 1 }
 0x145   : > { %v449_v7 = vrot.slane %v448_v5, 1 }
 0x146   : > { %v443_v8 = vmax.f32 %v441_v4, %v442_v6 }
 0x147   : > { %v450_v9 = vmax.f32 %v448_v5, %v449_v7 }
 0x148   : > { %v451_v10 = vsub.f32 %v416_v57, %v443_v8 }
 0x149   : > { %v452_v11 = vsub.f32 %v417_v59, %v450_v9 }
 0x14a   : > { %v453_v12 = vmul.f32 1.442695, %v451_v10 }
 0x14b   : > { %v455_v13 = vmul.f32 1.442695, %v452_v11 }
 0x14c   : > { %757 = vpow2.f32 %v453_v12 }
 0x14d   : > { %759 = vpow2.f32 %v455_v13 }
 0x156   : > { %v758_v14 = vpop.eup %757 }
 0x157   : > { %v760_v15 = vpop.eup %759  ;;  %v457_v16 = vsel %vm436_vm3, %v758_v14, 0.0 }
 0x158   : > { %v458_v17 = vrot.slane %v457_v16, 4  ;;  %v464_v18 = vsel %vm436_vm3, %v760_v15, 0.0 }
 0x159   : > { %v465_v19 = vrot.slane %v464_v18, 4 }
 0x15a   : > { %v459_v20 = vadd.f32 %v458_v17, %v457_v16 }
 0x15b   : > { %v466_v21 = vadd.f32 %v465_v19, %v464_v18 }
 0x15c   : > { %v460_v22 = vrot.slane %v459_v20, 2 }
 0x15d   : > { %v467_v23 = vrot.slane %v466_v21, 2 }
 0x15e   : > { %v461_v24 = vadd.f32 %v460_v22, %v459_v20 }
 0x15f   : > { %v468_v25 = vadd.f32 %v467_v23, %v466_v21 }
 0x160   : > { %v462_v26 = vrot.slane %v461_v24, 1 }
 0x161   : > { %v469_v27 = vrot.slane %v468_v25, 1 }
 0x162   : > { %v463_v28 = vadd.f32 %v462_v26, %v461_v24 }
 0x163   : > { %v470_v29 = vadd.f32 %v469_v27, %v468_v25 }
 0x164   : > { %761 = vrcp.f32 %v463_v28 }
 0x165   : > { %763 = vrcp.f32 %v470_v29 }
 0x16e   : > { %v762_v30 = vpop.eup %761 }
 0x16f   : > { %v764_v31 = vpop.eup %763  ;;  %v475_v32 = vmul.f32 %v762_v30, %v758_v14 }
 0x170   : > { %v476_v33 = vmul.f32 %v764_v31, %v760_v15 }
 0x171   : > { %v496_v34 = vmul.f32 %v1116_v35, %v475_v32 }
 0x172   : > { %v497_v38 = vmul.f32 %v1118_v36, %v476_v33  ;;  %v503_v39 = vadd.f32 %v476_v33, %v475_v32 }
 0x174   : > { %v498_v41 = vadd.f32 %v497_v38, %v496_v34  ;;  %v504_v42 = vadd.f32 %v657_v37, %v503_v39 }
 0x176   : > { %v499_v35 = vadd.f32 %v498_v41, %v495_v40  ;;  %658 = vst [vmem:[%s1106_s29 + $0x4] sm:$0xf] %v504_v42 }
 0x178   : > { %500 = vst [vmem:[%s1106_s29] sm:$0xf] %v499_v35 }
 0x179   : > { %836 = shalt.err (!%p833_p13)
}
 0x17a   : > { %s837_s26 = scalar_lea.hbm %s1137_s27, 192  ;;  %s841_s23 = scalar_lea.hbm %s1193_s3, 384 }
 0x17b   : > { %p838_p2 = scmp.ne.s32.totalorder %s1137_s27, %s837_s26  ;;  %p842_p4 = scmp.lt.u32.totalorder %s1137_s27, %s1193_s3 }
 0x17c   : > { %p843_p5 = scmp.lt.u32.totalorder %s841_s23, %s837_s26  ;;  %p845_p10 = scmp.lt.u32.totalorder %s837_s26, %s1137_s27 }
 0x17d   : > { %p839_p6 = pnand %p838_p2, %p1214_p11 }
 0x17e   : > { %p844_p8 = por %p843_p5, %p842_p4 }
 0x17f   : > { %p840_p12 = pneg %p839_p6 }
 0x180   : > { %p846_p1 = por %p845_p10, %p844_p8 }
 0x182   : > { %p847_p0 = pnand %p846_p1, %p840_p12 }
 0x184   : > { %850 = shalt.err (!%p847_p0)
}
 0x185   : > { %s917_s5 = smov 64   ;;  %s918_s20 = smov 4  }
 0x186   : > { %681 = dma.vmem_to_hbm [thread:$0]  (%p1214_p11), %s1139_s6, 192, %s1137_s27, %s512_s15, %s917_s5, %s917_s5, %s918_s20  }
 0x187 PF: > { %s542_s11 = sand.u32 1, %s889_s12   ;;  %p1215_p9 = scmp.ne.s32.totalorder %s1204_s25, 0 }
 0x188   : > { %p1216_p3 = scmp.ge.s32.totalorder %s909_s17, 2  ;;  %s543_s19 = scalar_lea.sflag [#allocation4], %s542_s11 }
 0x18a   : > { %p692_p7 = pnand %p1216_p3, %p1215_p9 }
 0x18c   : > { %884 = dma.done.wait (!%p692_p7), %s543_s19, 192  }
 0x18d   : > { %886 = vsyncadd (!%p692_p7), %s543_s19, 4294967104  ;;  %s20_s17 = sadd.s32 1, %s909_s17   ;;  %s1217_s12 = smov %s893_s13 }
 0x18e   : > { %p17_p13 = scmp.ge.s32.totalorder %s20_s17, 4   ;;  %s1218_s13 = smov %s897_s14 }
 0x18f   : > { %s1219_s14 = smov %s1058_s28  ;;  %s1220_s15 = smov %s905_s16 }
 0x190   : > { %s1221_s16 = smov %s1223_s4  ;;  %19 = sbr.rel (!%p17_p13) target bundleno = 7 (0x7), region = 90 }
 0x197   :  { %548 = vsyncpa [#allocation3], 1 }
 0x198   :  { %550 = vsyncpa [#allocation3 + $0x1], 1 }
 0x199   :  { %551 = vsyncpa [#allocation6], 1 }
 0x19a   :  { %552 = vsyncpa [#allocation4], 1 }
 0x19b   :  { %554 = vsyncpa [#allocation4 + $0x1], 1 }

</bundles_post_ra>
